<compile_context>
chip_gen: v7x
topology: tpu7x:2x2x1
jax: 0.10.0
libtpu: 0.0.40
codegen_flags: <defaults>
</compile_context>

<pallas_src>
import functools

import jax
import jax.numpy as jnp
from jax.experimental import pallas as pl
from jax.experimental.pallas import tpu as pltpu


def _gdl_partials_kernel(logits_ref, tgt_ref, inter_ref, lsum_ref, tsum_ref,
                         *, n_channels, split, tiles_per_part, n_tiles,
                         guard_tail):
    t = pl.program_id(1)

    @pl.when(t == 0)
    def _init():
        inter_ref[...] = jnp.zeros_like(inter_ref)
        lsum_ref[...] = jnp.zeros_like(lsum_ref)
        tsum_ref[...] = jnp.zeros_like(tsum_ref)

    def _accumulate():
        lg = logits_ref[0].astype(jnp.float32)                 # (C, TM) f32
        labels = tgt_ref[0].astype(jnp.int32)                  # (1, TM) i32
        # (C, 1) channel-id iota; broadcasting expands it in the compare.
        ch = jax.lax.broadcasted_iota(jnp.int32, (n_channels, 1), 0)
        one_hot = (labels == ch).astype(jnp.float32)           # (C, TM)
        inter_ref[...] += jnp.sum(lg * one_hot, axis=-1, keepdims=True)[None]
        lsum_ref[...] += jnp.sum(lg, axis=-1, keepdims=True)[None]
        tsum_ref[...] += jnp.sum(one_hot, axis=-1, keepdims=True)[None]

    if guard_tail:
        # Uneven 2-way megacore split: the last block of the second part may be
        # a clamped duplicate -- skip it with a scalar predicate (no vector mask).
        p = pl.program_id(0)
        blk = (p % split) * tiles_per_part + t
        pl.when(blk < n_tiles)(_accumulate)
    else:
        _accumulate()


def _round_down(x, m):
    return (x // m) * m


def generalized_dice_loss(logits, targets, *, epsilon=1e-5, max_tile_m=1 << 19):
    """logits: (N, C, D, H, W) float; targets: (N, D, H, W) integer class ids."""
    N, C, D, H, W = logits.shape
    M = D * H * W

    if not jnp.issubdtype(targets.dtype, jnp.integer):
        targets = targets.astype(jnp.int32)

    # Free reshapes -- no transpose, no copy of the big logits tensor.
    lg = logits.reshape(N, C, M)
    tgt = targets.reshape(N, 1, M)

    lg_bytes = jnp.dtype(lg.dtype).itemsize
    tgt_bytes = jnp.dtype(tgt.dtype).itemsize

    # --- VMEM-aware tile size along the flattened spatial axis --------------
    try:
        vmem_cap = int(pltpu.get_tpu_info().vmem_capacity_bytes)
    except Exception:
        vmem_cap = 64 * 1024 * 1024                      # conservative (v7x-sized)
    # Double-buffered streamed inputs + ~3 f32 (C, tile_m) in-kernel temporaries.
    bytes_per_col = 2 * (C * lg_bytes + tgt_bytes) + 3 * C * 4
    block_budget = max(vmem_cap // 10, 2 << 20)
    tile_m = min(block_budget // bytes_per_col, max_tile_m)
    tile_m = max(128, _round_down(tile_m, 128))
    tile_m = min(tile_m, max(128, _round_down(M, 128)))  # never exceed the data

    n_tiles = M // tile_m              # whole tiles -> kernel (unmasked)
    m_main = n_tiles * tile_m          # remainder (< tile_m) -> tiny JAX epilogue

    if n_tiles > 0:
        # Megacore: keep the "parallel" axis even (split M 2-way when N is odd).
        split = 2 if (N % 2 == 1 and n_tiles >= 2) else 1
        tiles_per_part = pl.cdiv(n_tiles, split)
        P = N * split
        guard_tail = split > 1 and tiles_per_part * split != n_tiles

        def in_map(p, t):
            if split == 1:
                return (p, 0, t)
            blk = (p % split) * tiles_per_part + t
            if guard_tail:
                blk = jnp.minimum(blk, n_tiles - 1)  # duplicate block; kernel skips it
            return (p // split, 0, blk)

        out_spec = pl.BlockSpec((1, C, 1), lambda p, t: (p, 0, 0))
        part_shape = jax.ShapeDtypeStruct((P, C, 1), jnp.float32)

        kernel = functools.partial(
            _gdl_partials_kernel, n_channels=C, split=split,
            tiles_per_part=tiles_per_part, n_tiles=n_tiles,
            guard_tail=guard_tail)

        cost = pl.CostEstimate(
            flops=6 * N * C * m_main,
            transcendentals=0,
            bytes_accessed=(N * C * m_main * lg_bytes
                            + N * m_main * tgt_bytes
                            + 3 * P * C * 4))

        inter_p, lsum_p, tsum_p = pl.pallas_call(
            kernel,
            out_shape=(part_shape, part_shape, part_shape),
            grid_spec=pltpu.PrefetchScalarGridSpec(
                num_scalar_prefetch=0,
                grid=(P, tiles_per_part),
                in_specs=[
                    pl.BlockSpec((1, C, tile_m), in_map),
                    pl.BlockSpec((1, 1, tile_m), in_map),
                ],
                out_specs=(out_spec, out_spec, out_spec),
            ),
            compiler_params=pltpu.CompilerParams(
                dimension_semantics=("parallel", "arbitrary"),
                vmem_limit_bytes=int(min(vmem_cap // 2, 96 * 1024 * 1024)),
            ),
            cost_estimate=cost,
        )(lg, tgt)

        inter = jnp.sum(inter_p, axis=(0, 2))            # (C,)
        lsum = jnp.sum(lsum_p, axis=(0, 2))
        tsum = jnp.sum(tsum_p, axis=(0, 2))
    else:
        inter = jnp.zeros((C,), jnp.float32)
        lsum = jnp.zeros((C,), jnp.float32)
        tsum = jnp.zeros((C,), jnp.float32)

    if m_main < M:
        # Ragged tail (< tile_m columns): negligible next to the streamed pass.
        lgr = lg[:, :, m_main:].astype(jnp.float32)
        ohr = (tgt[:, :, m_main:]
               == jnp.arange(C, dtype=jnp.int32).reshape(1, C, 1)
               ).astype(jnp.float32)
        inter = inter + jnp.sum(lgr * ohr, axis=(0, 2))
        lsum = lsum + jnp.sum(lgr, axis=(0, 2))
        tsum = tsum + jnp.sum(ohr, axis=(0, 2))

    # Tiny O(C) epilogue: log-softmax weighting + dice combine (matches PyTorch).
    union = lsum + tsum                                  # == sum(logits + one_hot)
    weights = 1.0 / (jax.nn.log_softmax(tsum) + epsilon)
    dice = jnp.sum(weights * inter) / jnp.sum(weights * union)
    return 1.0 - 2.0 * dice


def _reference_loss(logits, targets, n_labels, epsilon=1e-5):
    """Pure-JAX reference mirroring the PyTorch module exactly."""
    C = n_labels
    oh = jax.nn.one_hot(targets, C, axis=1, dtype=jnp.float32)      # (N,C,D,H,W)
    lg = jnp.transpose(logits.astype(jnp.float32), (1, 0, 2, 3, 4)).reshape(C, -1)
    tg = jnp.transpose(oh, (1, 0, 2, 3, 4)).reshape(C, -1)
    inter = jnp.sum(lg * tg, axis=-1)
    union = jnp.sum(lg + tg, axis=-1)
    tsum = jnp.sum(tg, axis=-1)
    w = 1.0 / (jax.nn.log_softmax(tsum) + epsilon)
    dice = jnp.sum(w * inter) / jnp.sum(w * union)
    return 1.0 - 2.0 * dice


if __name__ == "__main__":
    # Deterministic synthetic config: labels list defines the channel count.
    # TODO(synk): labels normally come from config.yaml; hardcoded here.
    labels = [0, 1, 2, 3]
    C = len(labels)

    key = jax.random.PRNGKey(0)
    k_logits, k_tgt, k_logits2, k_tgt2 = jax.random.split(key, 4)

    # --- Test 1: f32 logits, even batch, M an exact multiple of the tile ----
    N, D, H, W = 2, 4, 16, 16
    logits = jax.random.normal(k_logits, (N, C, D, H, W), dtype=jnp.float32)
    targets = jax.random.randint(k_tgt, (N, D, H, W), 0, C, dtype=jnp.int32)

    loss = jax.block_until_ready(generalized_dice_loss(logits, targets))
    ref = _reference_loss(logits, targets, C)
    assert jnp.allclose(loss, ref, rtol=1e-4, atol=1e-4), (loss, ref)

    # --- Test 2: bf16 logits (native-dtype streaming, f32 in-kernel accum) --
    logits_bf16 = logits.astype(jnp.bfloat16)
    loss_bf16 = jax.block_until_ready(generalized_dice_loss(logits_bf16, targets))
    ref_bf16 = _reference_loss(logits_bf16, targets, C)
    assert jnp.allclose(loss_bf16, ref_bf16, rtol=5e-3, atol=5e-3), (loss_bf16, ref_bf16)

    # --- Test 3: odd batch (2-way M split + scalar skip guard) + ragged tail
    N3, D3, H3, W3 = 3, 4, 16, 21            # M = 1344 -> 5 tiles of 256 + tail 64
    logits3 = jax.random.normal(k_logits2, (N3, C, D3, H3, W3), dtype=jnp.float32)
    targets3 = jax.random.randint(k_tgt2, (N3, D3, H3, W3), 0, C, dtype=jnp.int32)

    loss3 = jax.block_until_ready(
        generalized_dice_loss(logits3, targets3, max_tile_m=256))
    ref3 = _reference_loss(logits3, targets3, C)
    assert jnp.allclose(loss3, ref3, rtol=1e-4, atol=1e-4), (loss3, ref3)

    print("KERNEL_OK")
</pallas_src>

<mosaic_0001>
module attributes {stable_mosaic.version = 11 : i64} {
  func.func @_gdl_partials_kernel(%arg0: i32, %arg1: i32, %arg2: memref<1x4x1024xf32, #tpu.memory_space<vmem>>, %arg3: memref<1x1x1024xi32, #tpu.memory_space<vmem>>, %arg4: memref<1x4x1xf32, #tpu.memory_space<vmem>>, %arg5: memref<1x4x1xf32, #tpu.memory_space<vmem>>, %arg6: memref<1x4x1xf32, #tpu.memory_space<vmem>>) attributes {dimension_semantics = [#tpu.dimension_semantics<parallel>, #tpu.dimension_semantics<arbitrary>], iteration_bounds = array<i64: 2, 1>, scalar_prefetch = 0 : i64, scratch_operands = 0 : i64, tpu.core_type = #tpu.core_type<tc>, window_params = [{transform_indices = @transform_0, window_bounds = array<i64: 1, 4, 1024>}, {transform_indices = @transform_1, window_bounds = array<i64: 1, 1, 1024>}, {transform_indices = @transform_2, window_bounds = array<i64: 1, 4, 1>}, {transform_indices = @transform_3, window_bounds = array<i64: 1, 4, 1>}, {transform_indices = @transform_4, window_bounds = array<i64: 1, 4, 1>}]} {
    %c0_i32 = arith.constant 0 : i32
    %0 = arith.cmpi eq, %arg1, %c0_i32 : i32
    %1 = arith.extui %0 : i1 to i32
    %c0_i32_0 = arith.constant 0 : i32
    %2 = arith.cmpi ne, %1, %c0_i32_0 : i32
    scf.if %2 {
      %cst_26 = arith.constant 0.000000e+00 : f32
      %32 = vector.broadcast %cst_26 : f32 to vector<1x4x1xf32>
      %c0_27 = arith.constant 0 : index
      %c0_28 = arith.constant 0 : index
      %c0_29 = arith.constant 0 : index
      %33 = vector.load %arg4[%c0_27, %c0_28, %c0_29] : memref<1x4x1xf32, #tpu.memory_space<vmem>>, vector<1x4x1xf32>
      tpu.vector_store %arg4[%c0_27, %c0_28, %c0_29], %32 {strides = array<i32>} : memref<1x4x1xf32, #tpu.memory_space<vmem>>, vector<1x4x1xf32>,
      %cst_30 = arith.constant 0.000000e+00 : f32
      %34 = vector.broadcast %cst_30 : f32 to vector<1x4x1xf32>
      %c0_31 = arith.constant 0 : index
      %c0_32 = arith.constant 0 : index
      %c0_33 = arith.constant 0 : index
      %35 = vector.load %arg5[%c0_31, %c0_32, %c0_33] : memref<1x4x1xf32, #tpu.memory_space<vmem>>, vector<1x4x1xf32>
      tpu.vector_store %arg5[%c0_31, %c0_32, %c0_33], %34 {strides = array<i32>} : memref<1x4x1xf32, #tpu.memory_space<vmem>>, vector<1x4x1xf32>,
      %cst_34 = arith.constant 0.000000e+00 : f32
      %36 = vector.broadcast %cst_34 : f32 to vector<1x4x1xf32>
      %c0_35 = arith.constant 0 : index
      %c0_36 = arith.constant 0 : index
      %c0_37 = arith.constant 0 : index
      %37 = vector.load %arg6[%c0_35, %c0_36, %c0_37] : memref<1x4x1xf32, #tpu.memory_space<vmem>>, vector<1x4x1xf32>
      tpu.vector_store %arg6[%c0_35, %c0_36, %c0_37], %36 {strides = array<i32>} : memref<1x4x1xf32, #tpu.memory_space<vmem>>, vector<1x4x1xf32>,
    } else {
    }
    %c0 = arith.constant 0 : index
    %c0_1 = arith.constant 0 : index
    %c0_2 = arith.constant 0 : index
    %3 = vector.load %arg2[%c0, %c0_1, %c0_2] : memref<1x4x1024xf32, #tpu.memory_space<vmem>>, vector<1x4x1024xf32>
    %4 = vector.shape_cast %3 : vector<1x4x1024xf32> to vector<4x1024xf32>
    %c0_3 = arith.constant 0 : index
    %c0_4 = arith.constant 0 : index
    %c0_5 = arith.constant 0 : index
    %5 = vector.load %arg3[%c0_3, %c0_4, %c0_5] : memref<1x1x1024xi32, #tpu.memory_space<vmem>>, vector<1x1x1024xi32>
    %6 = vector.shape_cast %5 : vector<1x1x1024xi32> to vector<1x1024xi32>
    %7 = tpu.iota {dimensions = array<i32: 0>} : vector<4x1xi32>
    %8 = vector.broadcast %6 : vector<1x1024xi32> to vector<4x1024xi32>
    %9 = vector.broadcast %7 : vector<4x1xi32> to vector<4x1024xi32>
    %10 = arith.cmpi eq, %8, %9 : vector<4x1024xi32>
    %11 = arith.extui %10 : vector<4x1024xi1> to vector<4x1024xi32>
    %12 = arith.sitofp %11 : vector<4x1024xi32> to vector<4x1024xf32>
    %c0_6 = arith.constant 0 : index
    %c0_7 = arith.constant 0 : index
    %c0_8 = arith.constant 0 : index
    %13 = vector.load %arg4[%c0_6, %c0_7, %c0_8] : memref<1x4x1xf32, #tpu.memory_space<vmem>>, vector<1x4x1xf32>
    %14 = arith.mulf %4, %12 : vector<4x1024xf32>
    %cst = arith.constant dense<0.000000e+00> : vector<4xf32>
    %15 = vector.multi_reduction <add>, %14, %cst [1] : vector<4x1024xf32> to vector<4xf32>
    %16 = vector.shape_cast %15 : vector<4xf32> to vector<4x1xf32>
    %17 = vector.shape_cast %16 : vector<4x1xf32> to vector<1x4x1xf32>
    %18 = arith.addf %13, %17 : vector<1x4x1xf32>
    %c0_9 = arith.constant 0 : index
    %c0_10 = arith.constant 0 : index
    %c0_11 = arith.constant 0 : index
    %19 = vector.load %arg4[%c0_9, %c0_10, %c0_11] : memref<1x4x1xf32, #tpu.memory_space<vmem>>, vector<1x4x1xf32>
    tpu.vector_store %arg4[%c0_9, %c0_10, %c0_11], %18 {strides = array<i32>} : memref<1x4x1xf32, #tpu.memory_space<vmem>>, vector<1x4x1xf32>,
    %c0_12 = arith.constant 0 : index
    %c0_13 = arith.constant 0 : index
    %c0_14 = arith.constant 0 : index
    %20 = vector.load %arg5[%c0_12, %c0_13, %c0_14] : memref<1x4x1xf32, #tpu.memory_space<vmem>>, vector<1x4x1xf32>
    %cst_15 = arith.constant dense<0.000000e+00> : vector<4xf32>
    %21 = vector.multi_reduction <add>, %4, %cst_15 [1] : vector<4x1024xf32> to vector<4xf32>
    %22 = vector.shape_cast %21 : vector<4xf32> to vector<4x1xf32>
    %23 = vector.shape_cast %22 : vector<4x1xf32> to vector<1x4x1xf32>
    %24 = arith.addf %20, %23 : vector<1x4x1xf32>
    %c0_16 = arith.constant 0 : index
    %c0_17 = arith.constant 0 : index
    %c0_18 = arith.constant 0 : index
    %25 = vector.load %arg5[%c0_16, %c0_17, %c0_18] : memref<1x4x1xf32, #tpu.memory_space<vmem>>, vector<1x4x1xf32>
    tpu.vector_store %arg5[%c0_16, %c0_17, %c0_18], %24 {strides = array<i32>} : memref<1x4x1xf32, #tpu.memory_space<vmem>>, vector<1x4x1xf32>,
    %c0_19 = arith.constant 0 : index
    %c0_20 = arith.constant 0 : index
    %c0_21 = arith.constant 0 : index
    %26 = vector.load %arg6[%c0_19, %c0_20, %c0_21] : memref<1x4x1xf32, #tpu.memory_space<vmem>>, vector<1x4x1xf32>
    %cst_22 = arith.constant dense<0.000000e+00> : vector<4xf32>
    %27 = vector.multi_reduction <add>, %12, %cst_22 [1] : vector<4x1024xf32> to vector<4xf32>
    %28 = vector.shape_cast %27 : vector<4xf32> to vector<4x1xf32>
    %29 = vector.shape_cast %28 : vector<4x1xf32> to vector<1x4x1xf32>
    %30 = arith.addf %26, %29 : vector<1x4x1xf32>
    %c0_23 = arith.constant 0 : index
    %c0_24 = arith.constant 0 : index
    %c0_25 = arith.constant 0 : index
    %31 = vector.load %arg6[%c0_23, %c0_24, %c0_25] : memref<1x4x1xf32, #tpu.memory_space<vmem>>, vector<1x4x1xf32>
    tpu.vector_store %arg6[%c0_23, %c0_24, %c0_25], %30 {strides = array<i32>} : memref<1x4x1xf32, #tpu.memory_space<vmem>>, vector<1x4x1xf32>,
    return
  }
  func.func @transform_0(%arg0: i32, %arg1: i32) -> (i32, i32, i32) {
    %c0_i32 = arith.constant 0 : i32
    %c0_i32_0 = arith.constant 0 : i32
    return %arg0, %c0_i32, %arg1 : i32, i32, i32
  }
  func.func @transform_1(%arg0: i32, %arg1: i32) -> (i32, i32, i32) {
    %c0_i32 = arith.constant 0 : i32
    %c0_i32_0 = arith.constant 0 : i32
    return %arg0, %c0_i32, %arg1 : i32, i32, i32
  }
  func.func @transform_2(%arg0: i32, %arg1: i32) -> (i32, i32, i32) {
    %c0_i32 = arith.constant 0 : i32
    %c0_i32_0 = arith.constant 0 : i32
    %c0_i32_1 = arith.constant 0 : i32
    return %arg0, %c0_i32, %c0_i32_0 : i32, i32, i32
  }
  func.func @transform_3(%arg0: i32, %arg1: i32) -> (i32, i32, i32) {
    %c0_i32 = arith.constant 0 : i32
    %c0_i32_0 = arith.constant 0 : i32
    %c0_i32_1 = arith.constant 0 : i32
    return %arg0, %c0_i32, %c0_i32_0 : i32, i32, i32
  }
  func.func @transform_4(%arg0: i32, %arg1: i32) -> (i32, i32, i32) {
    %c0_i32 = arith.constant 0 : i32
    %c0_i32_0 = arith.constant 0 : i32
    %c0_i32_1 = arith.constant 0 : i32
    return %arg0, %c0_i32, %c0_i32_0 : i32, i32, i32
  }
}

</mosaic_0001>

<bundles_post_ra>
// kernel: tpu_custom_call.1
= control target key start
LH: loop header
LB: loop body
LE: loop exit
PB: predicated region body
PF: predicated region fallthrough
CT: control target
= control target key end

     0   :  { %10 = vsyncpa [#allocation3], 0  ;;  %s1102_s0 = inlined_call_operand.hbm [shape: f32[2,4,1024], index: 0, kind: input, shape index: {}]   ;;  %s1103_s1 = inlined_call_operand.hbm [shape: s32[2,1,1024], index: 1, kind: input, shape index: {}]   ;;  %s1104_s2 = inlined_call_operand.vmem [shape: f32[2,4,1], index: 2, kind: output, shape index: {0}]   ;;  %s1105_s3 = inlined_call_operand.vmem [shape: f32[2,4,1], index: 3, kind: output, shape index: {1}]   ;;  %s1106_s4 = inlined_call_operand.vmem [shape: f32[2,4,1], index: 4, kind: output, shape index: {2}]  }
   0x1   :  { %12 = vsyncpa [#allocation3 + $0x1], 0 }
   0x2   :  { %13 = vsyncpa [#allocation5], 0 }
   0x3   :  { %15 = vsyncpa [#allocation5 + $0x1], 0  ;;  %s873_s15 = smov 0   ;;  %s875_s16 = smov 0  }
   0x4   :  { %s877_s17 = smov 0   ;;  %s879_s18 = smov 0  }
   0x5   :  { %s881_s19 = smov 0   ;;  %s883_s20 = smov 0  }
   0x6 LB: > { %s636_s21 = sadd.s32 4294967295, %s843_s20   ;;  %s33_s22 = sadd.s32 1, %s839_s19  ;;  %s843_s20 = sphi %s883_s20, %s21_s20   ;;  %s839_s19 = sphi %s881_s19, %s1120_s19   ;;  %s835_s18 = sphi %s879_s18, %s1119_s18   ;;  %s831_s17 = sphi %s877_s17, %s1118_s17   ;;  %s827_s16 = sphi %s875_s16, %s1117_s16   ;;  %s823_s15 = sphi %s873_s15, %s1116_s15  }
   0x7   : > { %p35_p0 = scmp.ge.s32.totalorder %s33_s22, 2  ;;  %s42_s23 = sadd.s32 1, %s831_s17 }
   0x8   : > { %p49_p1 = scmp.ne.s32.totalorder %s831_s17, %s827_s16  ;;  %p50_p2 = scmp.eq.s32.totalorder %s843_s20, 0 }
   0x9   : > { %s1122_s22 = smov (%p35_p0, %s33_s22), 0  ;;  %p55_p4 = scmp.ne.s32.totalorder %s827_s16, %s823_s15 }
   0xa   : > { %p909_p3 = por %p50_p2, %p49_p1  ;;  %s37_s25 = ssub.s32 %s839_s19, %s1122_s22 }
   0xb   : > { %p56_p5 = scmp.eq.s32.totalorder %s636_s21, 0  ;;  %p40_p6 = scmp.eq.s32.totalorder %s37_s25, 0 }
   0xc   : > { %p675_p8 = scmp.lt.s32.totalorder %s843_s20, 2  ;;  %s925_s28 = sand.u32 1, %s831_s17  }
   0xd   : > { %p916_p7 = por %p56_p5, %p55_p4  ;;  %s662_s29 = sshll.u32 %s839_s19, 9 }
   0xe   : > { %s922_s27 = scalar_select %p40_p6, %s831_s17, %s42_s23  }
   0xf   : > { %s1109_s26 = scalar_select %p916_p7, 1, 0 }
  0x10   : > { %s640_s30 = sshll.u32 %s925_s28, 5  ;;  %s932_s7 = scalar_lea.hbm %s1102_s0, %s662_s29 }
  0x11   : > { %s189_s8 = scalar_lea.vmem [#allocation2], %s640_s30  ;;  %p936_p9 = pnand %p675_p8, %p909_p3 }
  0x12   : > { %s199_s9 = sshll.u32 %s189_s8, 4  ;;  %s186_s11 = scalar_lea.sflag [#allocation3], %s925_s28  ;;  %s940_s9 = int_to_ptr.vmem [resolvable:$true] %s199_s9 }
  0x13   : > { %s729_s12 = scalar_lea.hbm %s932_s7, 512  ;;  %p731_p13 = pneg %p936_p9 }
  0x14   : > { %p730_p12 = scmp.ne.s32.totalorder %s932_s7, %s729_s12  ;;  %s734_s15 = scalar_lea.hbm %s1102_s0, 1024 }
  0x15   : > { %p735_p2 = scmp.lt.u32.totalorder %s932_s7, %s1102_s0  ;;  %p736_p3 = scmp.lt.u32.totalorder %s734_s15, %s729_s12 }
  0x16   : > { %p732_p0 = pnand %p731_p13, %p730_p12  ;;  %p738_p5 = scmp.lt.u32.totalorder %s729_s12, %s932_s7 }
  0x17   : > { %p737_p4 = por %p736_p3, %p735_p2 }
  0x18   : > { %p733_p1 = pneg %p732_p0 }
  0x19   : > { %p739_p6 = por %p738_p5, %p737_p4 }
  0x1b   : > { %p740_p8 = pnand %p739_p6, %p733_p1 }
  0x1d   : > { %743 = shalt.err (!%p740_p8)
}
  0x1e   : > { %s744_s24 = scalar_lea.vmem %s940_s9, 512  ;;  %s845_s25 = smov [#allocation2]  }
  0x1f   : > { %p745_p12 = scmp.ne.s32.totalorder %s940_s9, %s744_s24  ;;  %s749_s29 = sshll.u32 %s845_s25, 4  ;;  %s750_s29 = int_to_ptr.vmem [resolvable:$false] %s749_s29 }
  0x20   : > { %s751_s30 = scalar_lea.vmem %s750_s29, 1024  ;;  %p752_p11 = scmp.lt.s32.totalorder %s940_s9, %s750_s29 }
  0x21   : > { %p747_p0 = pnand %p745_p12, %p731_p13  ;;  %p753_p2 = scmp.lt.s32.totalorder %s751_s30, %s744_s24 }
  0x23   : > { %p748_p10 = pneg %p747_p0  ;;  %p754_p3 = por %p753_p2, %p752_p11 }
  0x25   : > { %p755_p4 = pnand %p754_p3, %p748_p10 }
  0x27   : > { %758 = shalt.err (!%p755_p4)
}
  0x28   : > { %671 = dma.hbm_to_vmem [thread:$0]  (!%p936_p9), %s932_s7, 512, %s940_s9, %s186_s11  }
  0x29   : > { %p1111_p1 = scmp.lt.s32.totalorder %s843_s20, 3  ;;  %p1112_p5 = scmp.ge.s32.totalorder %s843_s20, 1 }
  0x2a   : > { %s643_s6 = sshll.u32 %s925_s28, 3  ;;  %s663_s8 = sshll.u32 %s839_s19, 7 }
  0x2b   : > { %p974_p6 = pnand %p1112_p5, %p1111_p1  ;;  %s983_s14 = scalar_lea.hbm %s1103_s1, %s663_s8 }
  0x2c   : > { %s210_s15 = scalar_lea.vmem [#allocation4], %s643_s6  ;;  %s207_s7 = scalar_lea.sflag [#allocation5], %s925_s28 }
  0x2d   : > { %s1113_s5 = scalar_select %p974_p6, 1, 0 }
  0x2e   : > { %s220_s21 = sshll.u32 %s210_s15, 4  ;;  %s759_s9 = scalar_lea.hbm %s983_s14, 128  ;;  %s221_s21 = int_to_ptr.vmem [resolvable:$true] %s220_s21 }
  0x2f   : > { %p760_p10 = scmp.ne.s32.totalorder %s983_s14, %s759_s9  ;;  %s764_s24 = scalar_lea.hbm %s1103_s1, 256 }
  0x30   : > { %p765_p12 = scmp.lt.u32.totalorder %s983_s14, %s1103_s1  ;;  %p766_p0 = scmp.lt.u32.totalorder %s764_s24, %s759_s9 }
  0x31   : > { %p762_p11 = pnand %p760_p10, %p731_p13  ;;  %p768_p3 = scmp.lt.u32.totalorder %s759_s9, %s983_s14 }
  0x32   : > { %p767_p2 = por %p766_p0, %p765_p12 }
  0x33   : > { %p763_p8 = pneg %p762_p11 }
  0x34   : > { %p769_p4 = por %p768_p3, %p767_p2 }
  0x36   : > { %p770_p1 = pnand %p769_p4, %p763_p8 }
  0x38   : > { %773 = shalt.err (!%p770_p1)
}
  0x39   : > { %s774_s28 = scalar_lea.vmem %s221_s21, 128  ;;  %s846_s30 = smov [#allocation4]  }
  0x3a   : > { %p775_p5 = scmp.ne.s32.totalorder %s221_s21, %s774_s28  ;;  %s779_s6 = sshll.u32 %s846_s30, 4  ;;  %s780_s6 = int_to_ptr.vmem [resolvable:$false] %s779_s6 }
  0x3b   : > { %s781_s8 = scalar_lea.vmem %s780_s6, 256  ;;  %p782_p7 = scmp.lt.s32.totalorder %s221_s21, %s780_s6 }
  0x3c   : > { %p777_p10 = pnand %p775_p5, %p731_p13  ;;  %p783_p6 = scmp.lt.s32.totalorder %s781_s8, %s774_s28 }
  0x3e   : > { %p778_p11 = pneg %p777_p10  ;;  %p784_p0 = por %p783_p6, %p782_p7 }
  0x40   : > { %p785_p12 = pnand %p784_p0, %p778_p11 }
  0x42   : > { %788 = shalt.err (!%p785_p12)
}
  0x43   : > { %674 = dma.hbm_to_vmem [thread:$0]  (!%p936_p9), %s983_s14, 128, %s221_s21, %s207_s7  }
  0x44   : > { %p1114_p8 = scmp.ne.s32.totalorder %s1113_s5, 0 }
  0x45   : > { %s231_s12 = sand.u32 (!%p1114_p8), 1, %s827_s16   ;;  %p1115_p13 = scmp.ne.s32.totalorder (!%p1114_p8), %s1109_s26, 0 }
  0x46   : > { %229 = sbr.rel (%p1114_p8) target bundleno = 263 (0x107), region = 28  ;;  %s647_s13 = sshll.u32 (!%p1114_p8), %s231_s12, 5 }
  0x47   : > { %s232_s15 = scalar_lea.sflag (!%p1114_p8), [#allocation3], %s231_s12  ;;  %s1008_s9 = scalar_lea.vmem (!%p1114_p8), [#allocation2], %s647_s13 }
  0x4d   : > { %814 = dma.done.wait (%p1115_p13), %s232_s15, 512  }
  0x4e   : > { %816 = vsyncadd (%p1115_p13), %s232_s15, 4294966784  ;;  %s648_s11 = sshll.u32 %s231_s12, 3  ;;  %s241_s10 = scalar_lea.sflag [#allocation5], %s231_s12 }
  0x4f   : > { %s244_s23 = scalar_lea.vmem [#allocation4], %s648_s11 }
  0x50   : > { %818 = dma.done.wait (%p1115_p13), %s241_s10, 128  }
  0x51   : > { %820 = vsyncadd (%p1115_p13), %s241_s10, 4294967168  ;;  %v308_v0 = vlaneseq  ;;  %p283_p7 = scmp.lt.s32.totalorder %s835_s18, 1  ;;  %vm299_vm0 = vcmask 3072   ;;  %v847_v10 = vmov 0.0   ;;  %v307_v11 = vld [vmem:[%s244_s23] sm:$0xff]  ;;  %vm399_vm9 = vcmask 1043456  }
  0x52   : > { %v303_v24 = vld [vmem:[%s1008_s9] sm:$0xff]  ;;  %v304_v25 = vld [vmem:[%s1008_s9 + $0x8] sm:$0xff]  ;;  %v305_v33 = vld [vmem:[%s1008_s9 + $0x10] sm:$0xff] }
  0x53   : > { %v309_v1 = vshrl.u32 %v308_v0, 7  ;;  %s1124_s18 = smov (!%p283_p7, %s835_s18), 1  ;;  %v425_v40 = vcombine.high %v303_v24, %v303_v24  ;;  %v306_v41 = vld [vmem:[%s1008_s9 + $0x18] sm:$0xff]  ;;  %v426_v47 = vcombine.high %v304_v25, %v304_v25  ;;  %v433_v51 = vsel %vm399_vm9, %v303_v24, 0.0 }
  0x54   : > { %s1020_s5 = sshll.u32 %s1124_s18, 2  ;;  %v436_v59 = vsel %vm399_vm9, %v304_v25, 0.0 }
  0x55   : > { %v312_v2 = vsub.s32 0, %v309_v1  ;;  %v316_v3 = vsub.s32 1, %v309_v1  ;;  %v320_v4 = vsub.s32 2, %v309_v1  ;;  %v324_v5 = vsub.s32 3, %v309_v1  ;;  %s1026_s7 = scalar_lea.vmem %s1104_s2, %s1020_s5  ;;  %s294_s24 = scalar_lea.vmem %s1106_s4, %s1020_s5 }
  0x56   : > { %v328_v6 = vsub.s32 4, %v309_v1  ;;  %v332_v7 = vsub.s32 5, %v309_v1  ;;  %v336_v8 = vsub.s32 6, %v309_v1  ;;  %v340_v9 = vsub.s32 7, %v309_v1  ;;  %300 = vst.msk [vmem:[%s1026_s7] sm:$0xf] %vm299_vm0, %v847_v10  ;;  %s290_s28 = scalar_lea.vmem %s1105_s3, %s1020_s5 }
  0x57   : > { %v313_v12 = vrot.slane %v307_v11, %v312_v2  ;;  %v317_v13 = vrot.slane %v307_v11, %v316_v3  ;;  %v321_v14 = vrot.slane %v307_v11, %v320_v4  ;;  %v325_v15 = vrot.slane %v307_v11, %v324_v5  ;;  %302 = vst.msk [vmem:[%s294_s24] sm:$0xf] %vm299_vm0, %v847_v10 }
  0x58   : > { %v329_v16 = vrot.slane %v307_v11, %v328_v6  ;;  %v333_v17 = vrot.slane %v307_v11, %v332_v7  ;;  %v337_v18 = vrot.slane %v307_v11, %v336_v8  ;;  %v341_v19 = vrot.slane %v307_v11, %v340_v9  ;;  %301 = vst.msk [vmem:[%s290_s28] sm:$0xf] %vm299_vm0, %v847_v10 }
  0x59   : > { %vm342_vm1 = vcmp.eq.s32.totalorder %v313_v12, %v309_v1  ;;  %vm343_vm2 = vcmp.eq.s32.totalorder %v317_v13, %v309_v1  ;;  %vm344_vm3 = vcmp.eq.s32.totalorder %v321_v14, %v309_v1  ;;  %vm345_vm4 = vcmp.eq.s32.totalorder %v325_v15, %v309_v1 }
  0x5a   : > { %vm346_vm5 = vcmp.eq.s32.totalorder %v329_v16, %v309_v1  ;;  %vm347_vm6 = vcmp.eq.s32.totalorder %v333_v17, %v309_v1  ;;  %vm348_vm7 = vcmp.eq.s32.totalorder %v337_v18, %v309_v1  ;;  %vm349_vm8 = vcmp.eq.s32.totalorder %v341_v19, %v309_v1 }
  0x5b   : > { %v652_v20 = vsel %vm342_vm1, 1.0, %v847_v10  ;;  %v653_v21 = vsel %vm343_vm2, 1.0, %v847_v10  ;;  %v654_v22 = vsel %vm344_vm3, 1.0, %v847_v10  ;;  %v655_v23 = vsel %vm345_vm4, 1.0, %v847_v10 }
  0x5c   : > { %v656_v26 = vsel %vm346_vm5, 1.0, %v847_v10  ;;  %v657_v27 = vsel %vm347_vm6, 1.0, %v847_v10  ;;  %v658_v28 = vsel %vm348_vm7, 1.0, %v847_v10  ;;  %v659_v29 = vsel %vm349_vm8, 1.0, %v847_v10 }
  0x5d   : > { %v375_v30 = vcombine.low %v652_v20, %v653_v21  ;;  %v376_v31 = vcombine.low %v654_v22, %v655_v23  ;;  %v377_v32 = vcombine.low %v656_v26, %v657_v27  ;;  %v453_v34 = vsel %vm399_vm9, %v652_v20, 0.0 }
  0x5e   : > { %v454_v35 = vsel %vm399_vm9, %v653_v21, 0.0  ;;  %v378_v38 = vcombine.low %v658_v28, %v659_v29  ;;  %v456_v45 = vsel %vm399_vm9, %v654_v22, 0.0  ;;  %v458_v50 = vsel %vm399_vm9, %v655_v23, 0.0 }
  0x5f   : > { %v383_v36 = vmul.f32 %v375_v30, %v303_v24  ;;  %v384_v37 = vmul.f32 %v376_v31, %v304_v25  ;;  %v455_v39 = vadd.f32 %v454_v35, %v453_v34  ;;  %v385_v42 = vmul.f32 %v377_v32, %v305_v33  ;;  %v452_v30 = vld [vmem:[%s294_s24] sm:$0xf] }
  0x60   : > { %v386_v52 = vmul.f32 %v378_v38, %v306_v41  ;;  %v460_v55 = vsel %vm399_vm9, %v656_v26, 0.0  ;;  %v434_v58 = vsel %vm399_vm9, %v425_v40, 0.0  ;;  %v462_v0 = vsel %vm399_vm9, %v657_v27, 0.0  ;;  %v366_v31 = vld [vmem:[%s1026_s7] sm:$0xf] }
  0x61   : > { %v391_v43 = vcombine.high %v383_v36, %v383_v36  ;;  %v392_v44 = vcombine.high %v384_v37, %v384_v37  ;;  %v400_v46 = vsel %vm399_vm9, %v383_v36, 0.0  ;;  %v403_v49 = vsel %vm399_vm9, %v384_v37, 0.0  ;;  %v420_v36 = vld [vmem:[%s290_s28] sm:$0xf] }
  0x62   : > { %v457_v54 = vadd.f32 %v456_v45, %v455_v39  ;;  %v393_v56 = vcombine.high %v385_v42, %v385_v42  ;;  %v435_v62 = vadd.f32 %v434_v58, %v433_v51  ;;  %v407_v63 = vsel %vm399_vm9, %v385_v42, 0.0 }
  0x63   : > { %v401_v48 = vsel %vm399_vm9, %v391_v43, 0.0  ;;  %v405_v57 = vsel %vm399_vm9, %v392_v44, 0.0  ;;  %v427_v1 = vcombine.high %v305_v33, %v305_v33  ;;  %v438_v2 = vsel %vm399_vm9, %v426_v47, 0.0 }
  0x64   : > { %v402_v53 = vadd.f32 %v401_v48, %v400_v46  ;;  %v459_v61 = vadd.f32 %v458_v50, %v457_v54  ;;  %v437_v5 = vadd.f32 %v436_v59, %v435_v62  ;;  %v394_v6 = vcombine.high %v386_v52, %v386_v52 }
  0x65   : > { %v409_v7 = vsel %vm399_vm9, %v393_v56, 0.0  ;;  %v464_v8 = vsel %vm399_vm9, %v658_v28, 0.0  ;;  %v440_v9 = vsel %vm399_vm9, %v305_v33, 0.0  ;;  %v411_v14 = vsel %vm399_vm9, %v386_v52, 0.0 }
  0x66   : > { %v404_v60 = vadd.f32 %v403_v49, %v402_v53  ;;  %v461_v4 = vadd.f32 %v460_v55, %v459_v61  ;;  %v439_v13 = vadd.f32 %v438_v2, %v437_v5  ;;  %v466_v15 = vsel %vm399_vm9, %v659_v29, 0.0 }
  0x67   : > { %v428_v16 = vcombine.high %v306_v41, %v306_v41  ;;  %v442_v17 = vsel %vm399_vm9, %v427_v1, 0.0  ;;  %v413_v21 = vsel %vm399_vm9, %v394_v6, 0.0  ;;  %v444_v22 = vsel %vm399_vm9, %v306_v41, 0.0 }
  0x68   : > { %v406_v3 = vadd.f32 %v405_v57, %v404_v60  ;;  %v463_v12 = vadd.f32 %v462_v0, %v461_v4  ;;  %v441_v20 = vadd.f32 %v440_v9, %v439_v13 }
  0x69   : > { %v446_v26 = vsel %vm399_vm9, %v428_v16, 0.0 }
  0x6a   : > { %v408_v11 = vadd.f32 %v407_v63, %v406_v3  ;;  %v465_v19 = vadd.f32 %v464_v8, %v463_v12  ;;  %v443_v25 = vadd.f32 %v442_v17, %v441_v20 }
  0x6c   : > { %v410_v18 = vadd.f32 %v409_v7, %v408_v11  ;;  %v467_v24 = vadd.f32 %v466_v15, %v465_v19  ;;  %v445_v28 = vadd.f32 %v444_v22, %v443_v25 }
  0x6e   : > { %v412_v23 = vadd.f32 %v411_v14, %v410_v18  ;;  %468 = vadd.xlane.f32.xlu1 %v467_v24  ;;  %v447_v29 = vadd.f32 %v446_v26, %v445_v28 }
  0x70   : > { %v414_v27 = vadd.f32 %v413_v21, %v412_v23 }
  0x72   : > { %415 = vadd.xlane.f32.xlu0 %v414_v27 }
  0x76   : > { %448 = vadd.xlane.f32.xlu0 %v447_v29 }
  0xfb   : > { %v469_v32 = vpop.xlane.xlu1 %468 }
  0xfc   : > { %v470_v33 = vadd.f32 %v469_v32, %v452_v30 }
  0xfe   : > { %471 = vst.msk [vmem:[%s294_s24] sm:$0xf] %vm299_vm0, %v470_v33 }
  0xff   : > { %v416_v34 = vpop.xlane.xlu0 %415 }
 0x100   : > { %v417_v35 = vadd.f32 %v416_v34, %v366_v31 }
 0x102   : > { %419 = vst.msk [vmem:[%s1026_s7] sm:$0xf] %vm299_vm0, %v417_v35 }
 0x103   : > { %v449_v37 = vpop.xlane.xlu0 %448 }
 0x104   : > { %v450_v38 = vadd.f32 %v449_v37, %v420_v36 }
 0x106   : > { %451 = vst.msk [vmem:[%s290_s28] sm:$0xf] %vm299_vm0, %v450_v38 }
 0x107 PF: > { %s21_s20 = sadd.s32 1, %s843_s20   ;;  %s1116_s15 = smov %s827_s16 }
 0x108   : > { %p18_p9 = scmp.ge.s32.totalorder %s21_s20, 4   ;;  %s1117_s16 = smov %s831_s17 }
 0x109   : > { %s1118_s17 = smov %s922_s27  ;;  %s1119_s18 = smov %s839_s19 }
 0x10a   : > { %s1120_s19 = smov %s1122_s22  ;;  %20 = sbr.rel (!%p18_p9) target bundleno = 6 (0x6), region = 109 }
 0x111   :  { %519 = vsyncpa [#allocation3], 1 }
 0x112   :  { %521 = vsyncpa [#allocation3 + $0x1], 1 }
 0x113   :  { %522 = vsyncpa [#allocation5], 1 }
 0x114   :  { %524 = vsyncpa [#allocation5 + $0x1], 1 }

</bundles_post_ra>
